<compile_context>
chip_gen: v7x
topology: tpu7x:2x2x1
jax: 0.10.0
libtpu: 0.0.40
codegen_flags: <defaults>
</compile_context>

<pallas_src>
import jax
import jax.numpy as jnp
from jax.experimental import pallas as pl
from jax.experimental.pallas import tpu as pltpu


def _masked_sse_kernel(thr_ref, x_ref, y_ref, psum_ref):
    """One row tile: (bb, 128) data + (bb, 1) lane thresholds -> (8, 128) partial SSE."""
    diff = x_ref[...].astype(jnp.float32) - y_ref[...].astype(jnp.float32)
    lane = jax.lax.broadcasted_iota(jnp.int32, diff.shape, 1)        # (bb, 128)
    sq = jnp.where(lane < thr_ref[...], diff * diff, 0.0)            # masked squared error
    bb = diff.shape[0]
    # Sublane-group partial sum: (bb, 128) -> (bb//8, 8, 128) -> sum over groups.
    # Pure elementwise VPU adds; the expensive cross-lane reduce stays in the wrapper.
    psum_ref[...] = jnp.sum(sq.reshape(bb // 8, 8, 128), axis=0)


def _round_up(x, m):
    return (x + m - 1) // m * m


def masked_mse_loss(output, target, length=None, mask_free=False, *, block_rows=2048):
    """Pallas equivalent of MaskedLoss(nn.MSELoss())(output, target, length)."""
    assert output.shape == target.shape
    B, T, D = output.shape

    if mask_free or length is None:
        # mask_free=True -> plain unmasked loss == full-length mask.
        length = jnp.full((B,), T, dtype=jnp.int32)
    # Clamp here because the valid-element count is computed in the wrapper.
    length = jnp.clip(length.astype(jnp.int32), 0, T)
    count = jnp.sum(length).astype(jnp.float32) * D   # number of valid elements

    # ---- lane-dense (R, 128) view --------------------------------------------
    C = T * D
    Cp = _round_up(C, 128)
    nchunk = Cp // 128

    x2 = output.reshape(B, C)
    y2 = target.reshape(B, C)
    if Cp != C:
        x2 = jnp.pad(x2, ((0, 0), (0, Cp - C)))
        y2 = jnp.pad(y2, ((0, 0), (0, Cp - C)))
    R = B * nchunk
    x2 = x2.reshape(R, 128)
    y2 = y2.reshape(R, 128)

    # Per-row valid-lane threshold (padded columns are automatically masked,
    # since length*D <= T*D <= global column index of any pad column).
    k = jnp.arange(nchunk, dtype=jnp.int32)
    thr = (length[:, None] * D - k[None, :] * 128).reshape(R, 1)

    # ---- row tiling -----------------------------------------------------------
    itemsize = jnp.dtype(output.dtype).itemsize
    bb = max(8, min(_round_up(R, 8), int(block_rows) // 8 * 8))
    Rp = _round_up(R, bb)
    if Rp != R:
        pad = Rp - R
        x2 = jnp.pad(x2, ((0, pad), (0, 0)))
        y2 = jnp.pad(y2, ((0, pad), (0, 0)))
        thr = jnp.pad(thr, ((0, pad), (0, 0)))   # threshold 0 -> padded rows fully masked
    num_tiles = Rp // bb

    # Explicit VMEM budget: 2 inputs double-buffered + lane-padded thr blocks + output.
    vmem_bytes = (2 * 2 * bb * 128 * itemsize) + (2 * bb * 128 * 4) + (2 * 8 * 128 * 4)
    vmem_limit = int(min(max(vmem_bytes + (4 << 20), 16 << 20), 32 << 20))

    partials = pl.pallas_call(
        _masked_sse_kernel,
        out_shape=jax.ShapeDtypeStruct((num_tiles * 8, 128), jnp.float32),
        grid_spec=pltpu.PrefetchScalarGridSpec(
            num_scalar_prefetch=0,
            grid=(num_tiles,),
            in_specs=[
                pl.BlockSpec((bb, 1), lambda i: (i, 0)),     # per-row lane thresholds
                pl.BlockSpec((bb, 128), lambda i: (i, 0)),   # output view
                pl.BlockSpec((bb, 128), lambda i: (i, 0)),   # target view
            ],
            out_specs=pl.BlockSpec((8, 128), lambda i: (i, 0)),
        ),
        compiler_params=pltpu.CompilerParams(
            dimension_semantics=("parallel",),   # independent tiles -> v7x megacore
            vmem_limit_bytes=vmem_limit,
        ),
    )(thr, x2, y2)

    # Tiny final cross-lane reduce + mean in plain JAX.
    # NB: all-zero lengths give count == 0 -> NaN, matching torch masked_select+mean.
    return jnp.sum(partials) / count


if __name__ == "__main__":
    key = jax.random.PRNGKey(0)
    k1, k2 = jax.random.split(key)

    # Shape consistent with the module: (batch, seq, feat).
    B, T, D = 2, 8, 32
    output = jax.random.normal(k1, (B, T, D), dtype=jnp.float32)
    target = jax.random.normal(k2, (B, T, D), dtype=jnp.float32)
    length = jnp.array([6, 8], dtype=jnp.int32)

    loss = masked_mse_loss(output, target, length)
    jax.block_until_ready(loss)

    # Pure-JAX reference (masked_select + MSELoss(reduction="mean") semantics).
    t_idx = jnp.arange(T)[None, :, None]
    mask = jnp.broadcast_to(t_idx < length[:, None, None], (B, T, D)).astype(jnp.float32)
    ref = jnp.sum((output - target) ** 2 * mask) / jnp.sum(mask)
    assert jnp.allclose(loss, ref, rtol=1e-5, atol=1e-5), (loss, ref)

    # mask_free path (plain unmasked mean).
    loss_free = masked_mse_loss(output, target, length, mask_free=True)
    jax.block_until_ready(loss_free)
    ref_free = jnp.mean((output - target) ** 2)
    assert jnp.allclose(loss_free, ref_free, rtol=1e-5, atol=1e-5), (loss_free, ref_free)

    # Odd shape: exercises column padding (T*D not a multiple of 128) and a zero length.
    B2, T2, D2 = 3, 5, 24
    o2 = jax.random.normal(k1, (B2, T2, D2), dtype=jnp.float32)
    t2 = jax.random.normal(k2, (B2, T2, D2), dtype=jnp.float32)
    l2 = jnp.array([5, 3, 0], dtype=jnp.int32)
    loss2 = masked_mse_loss(o2, t2, l2)
    jax.block_until_ready(loss2)
    ti2 = jnp.arange(T2)[None, :, None]
    m2 = jnp.broadcast_to(ti2 < l2[:, None, None], (B2, T2, D2)).astype(jnp.float32)
    ref2 = jnp.sum((o2 - t2) ** 2 * m2) / jnp.sum(m2)
    assert jnp.allclose(loss2, ref2, rtol=1e-5, atol=1e-5), (loss2, ref2)

    print("KERNEL_OK")
</pallas_src>

<mosaic_0001>
module attributes {stable_mosaic.version = 11 : i64} {
  func.func @_masked_sse_kernel(%arg0: i32, %arg1: memref<8x1xi32, #tpu.memory_space<vmem>>, %arg2: memref<8x128xf32, #tpu.memory_space<vmem>>, %arg3: memref<8x128xf32, #tpu.memory_space<vmem>>, %arg4: memref<8x128xf32, #tpu.memory_space<vmem>>) attributes {dimension_semantics = [#tpu.dimension_semantics<parallel>], iteration_bounds = array<i64: 1>, scalar_prefetch = 0 : i64, scratch_operands = 0 : i64, tpu.core_type = #tpu.core_type<tc>, window_params = [{transform_indices = @transform_0, window_bounds = array<i64: 8, 1>}, {transform_indices = @transform_1, window_bounds = array<i64: 8, 128>}, {transform_indices = @transform_2, window_bounds = array<i64: 8, 128>}, {transform_indices = @transform_3, window_bounds = array<i64: 8, 128>}]} {
    %c0 = arith.constant 0 : index
    %c0_0 = arith.constant 0 : index
    %0 = vector.load %arg2[%c0, %c0_0] : memref<8x128xf32, #tpu.memory_space<vmem>>, vector<8x128xf32>
    %c0_1 = arith.constant 0 : index
    %c0_2 = arith.constant 0 : index
    %1 = vector.load %arg3[%c0_1, %c0_2] : memref<8x128xf32, #tpu.memory_space<vmem>>, vector<8x128xf32>
    %2 = arith.subf %0, %1 : vector<8x128xf32>
    %3 = tpu.iota {dimensions = array<i32: 1>} : vector<8x128xi32>
    %c0_3 = arith.constant 0 : index
    %c0_4 = arith.constant 0 : index
    %4 = vector.load %arg1[%c0_3, %c0_4] : memref<8x1xi32, #tpu.memory_space<vmem>>, vector<8x1xi32>
    %5 = vector.broadcast %4 : vector<8x1xi32> to vector<8x128xi32>
    %6 = arith.cmpi slt, %3, %5 : vector<8x128xi32>
    %7 = arith.mulf %2, %2 : vector<8x128xf32>
    %cst = arith.constant 0.000000e+00 : f32
    %8 = vector.broadcast %cst : f32 to vector<8x128xf32>
    %9 = arith.select %6, %7, %8 : vector<8x128xi1>, vector<8x128xf32>
    %10 = vector.shape_cast %9 : vector<8x128xf32> to vector<1x8x128xf32>
    %cst_5 = arith.constant dense<0.000000e+00> : vector<8x128xf32>
    %11 = vector.multi_reduction <add>, %10, %cst_5 [0] : vector<1x8x128xf32> to vector<8x128xf32>
    %c0_6 = arith.constant 0 : index
    %c0_7 = arith.constant 0 : index
    %12 = vector.load %arg4[%c0_6, %c0_7] : memref<8x128xf32, #tpu.memory_space<vmem>>, vector<8x128xf32>
    tpu.vector_store %arg4[%c0_6, %c0_7], %11 {strides = array<i32>} : memref<8x128xf32, #tpu.memory_space<vmem>>, vector<8x128xf32>,
    return
  }
  func.func @transform_0(%arg0: i32) -> (i32, i32) {
    %c0_i32 = arith.constant 0 : i32
    %c0_i32_0 = arith.constant 0 : i32
    return %arg0, %c0_i32 : i32, i32
  }
  func.func @transform_1(%arg0: i32) -> (i32, i32) {
    %c0_i32 = arith.constant 0 : i32
    %c0_i32_0 = arith.constant 0 : i32
    return %arg0, %c0_i32 : i32, i32
  }
  func.func @transform_2(%arg0: i32) -> (i32, i32) {
    %c0_i32 = arith.constant 0 : i32
    %c0_i32_0 = arith.constant 0 : i32
    return %arg0, %c0_i32 : i32, i32
  }
  func.func @transform_3(%arg0: i32) -> (i32, i32) {
    %c0_i32 = arith.constant 0 : i32
    %c0_i32_0 = arith.constant 0 : i32
    return %arg0, %c0_i32 : i32, i32
  }
}

</mosaic_0001>

<bundles_post_ra>
// kernel: tpu_custom_call.1
= control target key start
LH: loop header
LB: loop body
LE: loop exit
PB: predicated region body
PF: predicated region fallthrough
CT: control target
= control target key end

     0   :  { %v70_v1 = vmov 0   ;;  %s113_s0 = inlined_call_operand.vmem [shape: s32[8,1], index: 0, kind: input, shape index: {}]   ;;  %s114_s1 = inlined_call_operand.vmem [shape: f32[8,128], index: 1, kind: input, shape index: {}]   ;;  %s115_s2 = inlined_call_operand.vmem [shape: f32[8,128], index: 2, kind: input, shape index: {}]   ;;  %s116_s3 = inlined_call_operand.hbm [shape: f32[8,128], index: 3, kind: output, shape index: {}]  }
   0x1   :  { %v20_v0 = vld [vmem:[%s113_s0] sm:$0xff]  ;;  %45 = vset.pattern.permute.xlu0 %v70_v1 }
   0x2   :  { %8 = vsyncpa [#allocation3], 0  ;;  %22 = vperm.xlu0 %45, %v20_v0   ;;  %v15_v2 = vld [vmem:[%s114_s1] sm:$0xff]  ;;  %v18_v4 = vlaneseq  ;;  %s71_s18 = smov [#allocation2]  }
   0x3   :  { %v16_v3 = vld [vmem:[%s115_s2] sm:$0xff]  ;;  %s35_s19 = sshll.u32 %s71_s18, 4  ;;  %s36_s19 = int_to_ptr.vmem [resolvable:$true] %s35_s19 }
   0x4   :  { %v17_v5 = vsub.f32 %v15_v2, %v16_v3  ;;  %v19_v6 = vand.u32 127, %v18_v4  ;;  %s46_s0 = scalar_lea.vmem %s36_s19, 128  ;;  %p51_p1 = scmp.lt.s32.totalorder %s36_s19, %s36_s19 }
   0x5   :  { %p47_p0 = scmp.ne.s32.totalorder %s36_s19, %s46_s0  ;;  %p52_p2 = scmp.lt.s32.totalorder %s46_s0, %s46_s0 }
   0x6   :  { %v25_v7 = vmul.f32 %v17_v5, %v17_v5 }
   0x7   :  { %p53_p3 = por %p52_p2, %p51_p1 }
   0x9   :  { %p54_p4 = pnand %p53_p3, %p47_p0 }
  0x81   :  { %v23_v8 = vpop.permute.xlu0 %22 }
  0x82   :  { %vm24_vm0 = vcmp.lt.s32.totalorder %v19_v6, %v23_v8 }
  0x83   :  { %v26_v9 = vsel %vm24_vm0, %v25_v7, 0.0 }
  0x84   :  { %28 = vst [vmem:[#allocation2] sm:$0xff] %v26_v9 }
  0x85   :  { %57 = shalt.err (!%p54_p4)
}
  0x86   :  { %s58_s20 = scalar_lea.hbm %s116_s3, 128 }
  0x87   :  { %p59_p5 = scmp.ne.s32.totalorder %s116_s3, %s58_s20  ;;  %p62_p6 = scmp.lt.u32.totalorder %s58_s20, %s116_s3 }
  0x89   :  { %p64_p7 = pnand %p62_p6, %p59_p5 }
  0x8b   :  { %67 = shalt.err (!%p64_p7)
}
  0x8c   :  { %38 = dma.vmem_to_hbm [thread:$0]  %s36_s19, 128, %s116_s3, [#allocation3]  }
  0x8d   :  { %68 = dma.done.wait [#allocation3], 128  }
  0x8e   :  { %69 = vsyncadd [#allocation3], 4294967168 }
  0x8f   :  { %42 = vsyncpa [#allocation3], 1 }

</bundles_post_ra>
